<compile_context>
chip_gen: v5e
topology: v5e:2x2
jax: 0.10.0
libtpu: 0.0.40
codegen_flags: <defaults>
</compile_context>

<pallas_src>
import functools

import jax
import jax.numpy as jnp
from jax import lax
from jax.experimental import pallas as pl
from jax.experimental.pallas import tpu as pltpu

_SUBLANE = 8


def _cdiv(a, b):
    return -(-a // b)


def _vmem_capacity_bytes():
    """Physical VMEM per TensorCore, with a conservative (v7x) fallback."""
    try:
        info = pltpu.get_tpu_info()
        for name in ("vmem_capacity_bytes", "vmem_size_bytes", "vmem_bytes"):
            v = getattr(info, name, None)
            if v:
                return int(v)
    except Exception:
        pass
    return 64 * 1024 * 1024


def _focal_loss_kernel(x_ref, t_ref, out_ref, *, gamma, n_rows, tile_n):
    """One batch tile -> (8, 1) partial sum of -(1 - p_t)^gamma * log p_t."""
    x = x_ref[...].astype(jnp.float32)            # (TN, C) logical shape
    tgt = t_ref[...]                              # (TN, 1) int32
    tn, c = x.shape

    # log-sum-exp over the class (lane) axis; single EUP exp per element.
    m = jnp.max(x, axis=-1, keepdims=True)        # (TN, 1)
    e = jnp.exp(x - m)                            # (TN, C)
    s = jnp.sum(e, axis=-1, keepdims=True)        # (TN, 1)

    # Gather the target-class logit with a one-hot select + lane reduction.
    class_ids = lax.broadcasted_iota(jnp.int32, (tn, c), 1)
    x_t = jnp.sum(jnp.where(class_ids == tgt, x, 0.0), axis=-1, keepdims=True)

    # Per-row focal term only (no full-matrix prob / log_prob / focal temps).
    lp_t = (x_t - m) - jnp.log(s)                 # log p_target, (TN, 1)
    p_t = jnp.exp(lp_t)
    q = 1.0 - p_t

    ig = int(gamma)
    if float(ig) == float(gamma) and 0 <= ig <= 8:
        # Integer gamma -> plain VPU multiplies (avoids an EUP log+exp pow).
        if ig == 0:
            qg = jnp.ones_like(q)
        else:
            qg = q
            for _ in range(ig - 1):
                qg = qg * q
    else:
        qg = q ** jnp.float32(gamma)              # non-integer gamma fallback

    loss_row = -(qg * lp_t)                       # (TN, 1)

    # Mask tail rows of the (possibly partial) last tile; padded/garbage rows
    # contribute exactly 0 (select, so NaNs in masked rows cannot propagate).
    row_ids = (pl.program_id(0) * tile_n
               + lax.broadcasted_iota(jnp.int32, (tn, 1), 0))
    loss_row = jnp.where(row_ids < n_rows, loss_row, 0.0)

    # Fold sublane groups with VPU adds: (TN, 1) -> (TN//8, 8, 1) -> (8, 1).
    out_ref[...] = jnp.sum(loss_row.reshape(tn // _SUBLANE, _SUBLANE, 1), axis=0)
    # TODO(synk): per-class `weight` tensor not implemented (module default is
    # None); it would need a weighted pick plus a weighted normalizer for 'mean'.


def focal_loss(logits, targets, gamma=2.0, weight=None, reduction="mean", tile_n=None):
    """logits: (N, C) float, targets: (N,) int -> scalar focal loss."""
    if weight is not None:
        raise NotImplementedError("per-class weight not supported")  # TODO(synk)

    n, c = logits.shape

    # --- generation-aware tiling ------------------------------------------
    vmem_cap = _vmem_capacity_bytes()                       # 64 MiB v7x / 128 MiB v5e,v6e
    vmem_limit = min((vmem_cap * 3) // 4, 96 * 1024 * 1024)  # 48 MiB v7x / 96 MiB v5e,v6e
    # Per-logits-block budget, leaving headroom for two in-flight input
    # buffers, full-tile f32 temporaries and the lane-padded targets blocks.
    per_block_budget = max(512 * 1024, vmem_limit // 8)

    if tile_n is None:
        rows = per_block_budget // (c * 4)                  # sized on f32 temporaries
        tile_n = int(min(4096, max(_SUBLANE, (rows // _SUBLANE) * _SUBLANE)))
    tile_n = max(_SUBLANE, (int(tile_n) // _SUBLANE) * _SUBLANE)
    # Keep >= 2 tiles whenever N allows so the "parallel" grid axis can shard
    # across both v7x TensorCores (harmless on single-TC v5e/v6e).
    if n >= 2 * _SUBLANE:
        half = ((_cdiv(n, 2) + _SUBLANE - 1) // _SUBLANE) * _SUBLANE
        tile_n = min(tile_n, half)
    # Don't pad a small batch up to a huge tile.
    tile_n = min(tile_n, ((n + _SUBLANE - 1) // _SUBLANE) * _SUBLANE)
    num_tiles = _cdiv(n, tile_n)

    t2d = targets.reshape(n, 1).astype(jnp.int32)           # tiny; no logits copy/pad

    kernel = functools.partial(
        _focal_loss_kernel, gamma=gamma, n_rows=n, tile_n=tile_n)

    itemsize = jnp.dtype(logits.dtype).itemsize
    cost = pl.CostEstimate(
        flops=int(6 * n * c),
        transcendentals=int(n * c + 2 * n),
        bytes_accessed=int(n * c * itemsize + n * 4 + num_tiles * _SUBLANE * 4),
    )

    partials = pl.pallas_call(
        kernel,
        out_shape=jax.ShapeDtypeStruct((num_tiles * _SUBLANE, 1), jnp.float32),
        grid_spec=pltpu.PrefetchScalarGridSpec(
            num_scalar_prefetch=0,
            grid=(num_tiles,),
            in_specs=[
                pl.BlockSpec((tile_n, c), lambda i: (i, 0)),   # full class extent
                pl.BlockSpec((tile_n, 1), lambda i: (i, 0)),
            ],
            out_specs=pl.BlockSpec((_SUBLANE, 1), lambda i: (i, 0)),
        ),
        compiler_params=pltpu.CompilerParams(
            dimension_semantics=("parallel",),   # independent tiles; megacore-friendly
            vmem_limit_bytes=int(vmem_limit),
        ),
        cost_estimate=cost,
    )(logits, t2d)

    total = jnp.sum(partials)
    if reduction == "mean":
        return total / jnp.float32(n)
    if reduction == "sum":
        return total
    raise NotImplementedError("reduction='none' not supported")  # TODO(synk)


def _focal_loss_ref(logits, targets, gamma=2.0):
    log_prob = jax.nn.log_softmax(logits.astype(jnp.float32), axis=-1)
    prob = jnp.exp(log_prob)
    focal = (1.0 - prob) ** gamma * log_prob
    picked = jnp.take_along_axis(focal, targets[:, None].astype(jnp.int32), axis=-1)[:, 0]
    return jnp.mean(-picked)


if __name__ == "__main__":
    key = jax.random.PRNGKey(0)
    k1, k2 = jax.random.split(key)

    N, C = 16, 32  # small batch of 16 examples, 32 classes
    logits = jax.random.normal(k1, (N, C), dtype=jnp.float32)
    targets = jax.random.randint(k2, (N,), 0, C, dtype=jnp.int32)

    loss = focal_loss(logits, targets, gamma=2.0)
    loss = jax.block_until_ready(loss)

    ref = _focal_loss_ref(logits, targets, gamma=2.0)
    assert jnp.allclose(loss, ref, rtol=1e-5, atol=1e-5), (loss, ref)

    print("KERNEL_OK")
</pallas_src>

<mosaic_0001>
module attributes {stable_mosaic.version = 11 : i64} {
  func.func @_focal_loss_kernel(%arg0: i32, %arg1: memref<8x32xf32, #tpu.memory_space<vmem>>, %arg2: memref<8x1xi32, #tpu.memory_space<vmem>>, %arg3: memref<8x1xf32, #tpu.memory_space<vmem>>) attributes {dimension_semantics = [#tpu.dimension_semantics<parallel>], iteration_bounds = array<i64: 2>, scalar_prefetch = 0 : i64, scratch_operands = 0 : i64, tpu.core_type = #tpu.core_type<tc>, window_params = [{transform_indices = @transform_0, window_bounds = array<i64: 8, 32>}, {transform_indices = @transform_1, window_bounds = array<i64: 8, 1>}, {transform_indices = @transform_2, window_bounds = array<i64: 8, 1>}]} {
    %c0 = arith.constant 0 : index
    %c0_0 = arith.constant 0 : index
    %0 = vector.load %arg1[%c0, %c0_0] : memref<8x32xf32, #tpu.memory_space<vmem>>, vector<8x32xf32>
    %c0_1 = arith.constant 0 : index
    %c0_2 = arith.constant 0 : index
    %1 = vector.load %arg2[%c0_1, %c0_2] : memref<8x1xi32, #tpu.memory_space<vmem>>, vector<8x1xi32>
    %cst = arith.constant dense<0xFF800000> : vector<8xf32>
    %2 = vector.multi_reduction <maximumf>, %0, %cst [1] : vector<8x32xf32> to vector<8xf32>
    %3 = vector.shape_cast %2 : vector<8xf32> to vector<8x1xf32>
    %4 = vector.broadcast %3 : vector<8x1xf32> to vector<8x32xf32>
    %5 = arith.subf %0, %4 : vector<8x32xf32>
    %6 = math.exp %5 : vector<8x32xf32>
    %cst_3 = arith.constant dense<0.000000e+00> : vector<8xf32>
    %7 = vector.multi_reduction <add>, %6, %cst_3 [1] : vector<8x32xf32> to vector<8xf32>
    %8 = vector.shape_cast %7 : vector<8xf32> to vector<8x1xf32>
    %9 = tpu.iota {dimensions = array<i32: 1>} : vector<8x32xi32>
    %10 = vector.broadcast %1 : vector<8x1xi32> to vector<8x32xi32>
    %11 = arith.cmpi eq, %9, %10 : vector<8x32xi32>
    %cst_4 = arith.constant 0.000000e+00 : f32
    %12 = vector.broadcast %cst_4 : f32 to vector<8x32xf32>
    %13 = arith.select %11, %0, %12 : vector<8x32xi1>, vector<8x32xf32>
    %cst_5 = arith.constant dense<0.000000e+00> : vector<8xf32>
    %14 = vector.multi_reduction <add>, %13, %cst_5 [1] : vector<8x32xf32> to vector<8xf32>
    %15 = vector.shape_cast %14 : vector<8xf32> to vector<8x1xf32>
    %16 = arith.subf %15, %3 : vector<8x1xf32>
    %17 = math.log %8 : vector<8x1xf32>
    %18 = arith.subf %16, %17 : vector<8x1xf32>
    %19 = math.exp %18 : vector<8x1xf32>
    %cst_6 = arith.constant 1.000000e+00 : f32
    %20 = vector.broadcast %cst_6 : f32 to vector<8x1xf32>
    %21 = arith.subf %20, %19 : vector<8x1xf32>
    %22 = arith.mulf %21, %21 : vector<8x1xf32>
    %23 = arith.mulf %22, %18 : vector<8x1xf32>
    %cst_7 = arith.constant 0.000000e+00 : f32
    %24 = vector.broadcast %cst_7 : f32 to vector<8x1xf32>
    %25 = arith.subf %24, %23 : vector<8x1xf32>
    %c8_i32 = arith.constant 8 : i32
    %26 = arith.muli %arg0, %c8_i32 : i32
    %27 = tpu.iota {dimensions = array<i32: 0>} : vector<8x1xi32>
    %28 = vector.broadcast %26 : i32 to vector<8x1xi32>
    %29 = arith.addi %28, %27 : vector<8x1xi32>
    %c16_i32 = arith.constant 16 : i32
    %30 = vector.broadcast %c16_i32 : i32 to vector<8x1xi32>
    %31 = arith.cmpi slt, %29, %30 : vector<8x1xi32>
    %cst_8 = arith.constant 0.000000e+00 : f32
    %32 = vector.broadcast %cst_8 : f32 to vector<8x1xf32>
    %33 = arith.select %31, %25, %32 : vector<8x1xi1>, vector<8x1xf32>
    %34 = vector.shape_cast %33 : vector<8x1xf32> to vector<1x8x1xf32>
    %cst_9 = arith.constant dense<0.000000e+00> : vector<8x1xf32>
    %35 = vector.multi_reduction <add>, %34, %cst_9 [0] : vector<1x8x1xf32> to vector<8x1xf32>
    %c0_10 = arith.constant 0 : index
    %c0_11 = arith.constant 0 : index
    %36 = vector.load %arg3[%c0_10, %c0_11] : memref<8x1xf32, #tpu.memory_space<vmem>>, vector<8x1xf32>
    tpu.vector_store %arg3[%c0_10, %c0_11], %35 {strides = array<i32>} : memref<8x1xf32, #tpu.memory_space<vmem>>, vector<8x1xf32>,
    return
  }
  func.func @transform_0(%arg0: i32) -> (i32, i32) {
    %c0_i32 = arith.constant 0 : i32
    %c0_i32_0 = arith.constant 0 : i32
    return %arg0, %c0_i32 : i32, i32
  }
  func.func @transform_1(%arg0: i32) -> (i32, i32) {
    %c0_i32 = arith.constant 0 : i32
    %c0_i32_0 = arith.constant 0 : i32
    return %arg0, %c0_i32 : i32, i32
  }
  func.func @transform_2(%arg0: i32) -> (i32, i32) {
    %c0_i32 = arith.constant 0 : i32
    %c0_i32_0 = arith.constant 0 : i32
    return %arg0, %c0_i32 : i32, i32
  }
}

</mosaic_0001>

<bundles_post_ra>
// kernel: tpu_custom_call.1
= control target key start
LH: loop header
LB: loop body
LE: loop exit
PB: predicated region body
PF: predicated region fallthrough
CT: control target
= control target key end

     0   :  { %s314_s9 = smov 0   ;;  %s347_s0 = inlined_call_operand.vmem [shape: f32[16,32], index: 0, kind: input, shape index: {}]   ;;  %s348_s1 = inlined_call_operand.vmem [shape: s32[16,1], index: 1, kind: input, shape index: {}]   ;;  %s349_s2 = inlined_call_operand.vmem [shape: f32[16,1], index: 2, kind: output, shape index: {}]  }
   0x1 LB: > { %s320_s10 = sadd.s32 4294967295, %s296_s9   ;;  %p267_p0 = scmp.ge.s32.totalorder %s296_s9, 1  ;;  %s296_s9 = sphi %s314_s9, %s12_s9  }
   0x2   : > { %p120_p1 = scmp.lt.s32.totalorder %s296_s9, 3 }
   0x4   : > { %p121_p2 = pnand %p267_p0, %p120_p1 }
   0x5   : > { %p144_p3 = scmp.lt.s32.totalorder (!%p121_p2), %s320_s10, 1  ;;  %s271_s19 = sshll.u32 (!%p121_p2), %s320_s10, 3 }
   0x6   : > { %124 = sbr.rel (%p121_p2) target bundleno = 294 (0x126), region = 28 }
   0xb   : > { %v298_v0 = vmov 0   ;;  %s145_s11 = scalar_select %p144_p3, %s320_s10, 1  ;;  %vm158_vm0 = vcmask 261120   ;;  %v168_v9 = vlaneseq  ;;  %v191_v22 = vstv %s271_s19 }
   0xc   : > { %283 = vset.pattern.permute.xlu0 %v298_v0  ;;  %vm196_vm3 = vcmask 7168  }
   0xd   : > { %s326_s12 = sshll.u32 %s145_s11, 3  ;;  %v169_v10 = vand.u32 127, %v168_v9  ;;  %v190_v21 = vshrl.u32 %v168_v9, 7 }
   0xe   : > { %s147_s15 = scalar_lea.vmem %s347_s0, %s326_s12  ;;  %s151_s18 = scalar_lea.vmem %s348_s1, %s326_s12 }
   0xf   : > { %v156_v1 = vld [vmem:[%s147_s15] sm:$0xff]  ;;  %v192_v25 = vadd.s32 %v191_v22, %v190_v21  ;;  %s155_s22 = scalar_lea.vmem %s349_s2, %s326_s12 }
  0x10   : > { %v159_v2 = vsel %vm158_vm0, %v156_v1, -inf  ;;  %v157_v3 = vld [vmem:[%s151_s18] sm:$0xff] }
  0x11   : > { %160 = vmax.xlane.f32.xlu0 %v159_v2  ;;  %vm193_vm2 = vcmp.lt.s32.totalorder %v192_v25, 16 }
  0x25   : > { %171 = vperm.xlu0 %283, %v157_v3  }
  0x84   : > { %v161_v4 = vpop.xlane.xlu0 %160 }
  0x85   : > { %v162_v5 = vsub.f32 %v156_v1, %v161_v4 }
  0x87   : > { %v163_v6 = vmul.f32 1.442695, %v162_v5 }
  0x89   : > { %284 = vpow2.f32 %v163_v6 }
  0x8f   : > { %v285_v7 = vpop.eup %284 }
  0x90   : > { %v165_v8 = vsel %vm158_vm0, %v285_v7, 0.0 }
  0x91   : > { %166 = vadd.xlane.f32.xlu1 %v165_v8 }
  0x97   : > { %v172_v11 = vpop.permute.xlu0 %171 }
  0x98   : > { %vm173_vm1 = vcmp.eq.s32.totalorder %v169_v10, %v172_v11 }
  0x99   : > { %v174_v12 = vsel %vm173_vm1, %v156_v1, 0.0 }
  0x9a   : > { %v175_v13 = vsel %vm158_vm0, %v174_v12, 0.0 }
  0x9b   : > { %176 = vadd.xlane.f32.xlu1 %v175_v13 }
 0x104   : > { %v167_v14 = vpop.xlane.xlu1 %166 }
 0x105   : > { %286 = vlog2.f32 %v167_v14 }
 0x10b   : > { %v287_v15 = vpop.eup %286 }
 0x10c   : > { %v180_v17 = vmul.f32 0.6931472, %v287_v15 }
 0x10e   : > { %v177_v16 = vpop.xlane.xlu1 %176 }
 0x10f   : > { %v178_v18 = vsub.f32 %v177_v16, %v161_v4 }
 0x111   : > { %v181_v19 = vsub.f32 %v178_v18, %v180_v17 }
 0x113   : > { %v182_v20 = vmul.f32 1.442695, %v181_v19 }
 0x115   : > { %288 = vpow2.f32 %v182_v20 }
 0x11b   : > { %v289_v23 = vpop.eup %288 }
 0x11c   : > { %v184_v24 = vsub.f32 1.0, %v289_v23 }
 0x11e   : > { %v185_v26 = vmul.f32 %v184_v24, %v184_v24 }
 0x120   : > { %v186_v27 = vmul.f32 %v185_v26, %v181_v19 }
 0x122   : > { %v187_v28 = vsub.f32 0.0, %v186_v27 }
 0x124   : > { %v194_v29 = vsel %vm193_vm2, %v187_v28, 0.0 }
 0x125   : > { %197 = vst.msk [vmem:[%s155_s22] sm:$0xff] %vm196_vm3, %v194_v29 }
 0x126 PF: > { %s12_s9 = sadd.s32 1, %s296_s9  }
 0x127   : > { %p9_p4 = scmp.ge.s32.totalorder %s12_s9, 4  }
 0x129   :  { %11 = sbr.rel (!%p9_p4) target bundleno = 1 (0x1), region = 61 }

</bundles_post_ra>
